<compile_context>
chip_gen: v6e
topology: v6e:2x2x1
jax: 0.10.0
libtpu: 0.0.40
codegen_flags: <defaults>
</compile_context>

<pallas_src>
import functools

import numpy as np
import jax
import jax.numpy as jnp
from jax.experimental import pallas as pl
from jax.experimental.pallas import tpu as pltpu


def _round_up(x, m):
    return ((x + m - 1) // m) * m


# ----------------------------- Pallas kernel ------------------------------- #

def _mel_kernel(frames_ref, basis_ref, fb_ref, logmel_ref, psum_ref, *, n_frames):
    """One (batch, frame-tile) grid step.

    frames_ref : (1, tile, n_fft)              raw (un-windowed) frames, bf16
    basis_ref  : (n_fft, 2*n_freq_pad)         fused [win*cos | -win*sin], bf16
    fb_ref     : (2*n_freq_pad, n_mels_pad)    stacked [fb; fb] filterbank, bf16
    logmel_ref : (1, tile, n_mels_pad)         log-mel output for this tile, f32
    psum_ref   : (1, 1, 8, n_mels_pad)         per-tile partial mel sums, f32
    """
    t = pl.program_id(1)

    fr = frames_ref[0]                                   # (tile, n_fft) bf16
    tile = fr.shape[0]
    n_mels_pad = fb_ref.shape[1]

    # Fused windowed real-DFT: ONE bf16 MXU matmul -> stacked [re | im] lanes.
    y = jnp.dot(fr, basis_ref[...], preferred_element_type=jnp.float32)

    # |X|^2 stacked as [re^2 | im^2]; mel = re^2 @ fb + im^2 @ fb via stacked fb.
    power = (y * y).astype(jnp.bfloat16)
    mel = jnp.dot(power, fb_ref[...], preferred_element_type=jnp.float32)

    logmel = jnp.log(mel + 1e-6)                         # (tile, n_mels_pad)
    logmel_ref[0] = logmel                               # lane-dense (128-wide) store

    # Per-tile partial sums over the *valid* frames only, written to an
    # (8,128)-aligned block (row 0 holds the sum, rows 1..7 are zero).
    row = jax.lax.broadcasted_iota(jnp.int32, (tile, 1), 0) + t * tile
    tile_sum = jnp.sum(jnp.where(row < n_frames, logmel, 0.0),
                       axis=0, keepdims=True)            # (1, n_mels_pad)
    sub = jax.lax.broadcasted_iota(jnp.int32, (8, n_mels_pad), 0)
    psum_ref[0, 0] = jnp.where(sub == 0, tile_sum, 0.0)


# ----------------------- deterministic constant setup ---------------------- #

def _hz_to_mel(f):
    return 2595.0 * np.log10(1.0 + f / 700.0)


def _mel_to_hz(m):
    return 700.0 * (10.0 ** (m / 2595.0) - 1.0)


def _mel_filterbank(n_freqs, n_mels, sample_rate, f_min=0.0, f_max=None):
    # torchaudio.functional.melscale_fbanks, mel_scale="htk", norm=None
    if f_max is None:
        f_max = sample_rate / 2.0
    all_freqs = np.linspace(0.0, sample_rate / 2.0, n_freqs)
    m_pts = np.linspace(_hz_to_mel(f_min), _hz_to_mel(f_max), n_mels + 2)
    f_pts = _mel_to_hz(m_pts)
    f_diff = f_pts[1:] - f_pts[:-1]
    slopes = f_pts[None, :] - all_freqs[:, None]         # (n_freqs, n_mels + 2)
    down = -slopes[:, :-2] / f_diff[:-1]
    up = slopes[:, 2:] / f_diff[1:]
    fb = np.maximum(0.0, np.minimum(down, up))
    return fb.astype(np.float32)                         # (n_freqs, n_mels)


class FeatureExtractorPallas:
    """Mel spectrogram + log + per-(batch, mel) mean subtraction over time."""

    def __init__(self, sample_rate=16000, n_fft=512, win_length=0.025,
                 hop_length=0.01, n_mels=80):
        self.n_fft = n_fft
        self.win_length = int(win_length * sample_rate)
        self.hop_length = int(hop_length * sample_rate)
        self.n_mels = n_mels
        self.n_mels_pad = _round_up(n_mels, 128)          # lane-dense output width

        n_freqs = n_fft // 2 + 1
        self.n_freqs = n_freqs

        # Hann window (periodic), center-padded to n_fft — matches torch.stft.
        n = np.arange(self.win_length)
        win = 0.5 * (1.0 - np.cos(2.0 * np.pi * n / self.win_length))
        lpad = (n_fft - self.win_length) // 2
        window = np.zeros(n_fft, dtype=np.float64)
        window[lpad:lpad + self.win_length] = win
        self.window_f32 = jnp.asarray(window.astype(np.float32))   # reference only

        # Full HTK mel filterbank (kept in f32 for the reference path).
        fb_full = _mel_filterbank(n_freqs, n_mels, sample_rate)     # (n_freqs, n_mels)
        self.fb_f32 = jnp.asarray(fb_full)

        # The DC and Nyquist filterbank rows are (numerically) zero for the
        # default f_min=0, f_max=sr/2, HTK, norm=None parameters, so those DFT
        # bins can be dropped.  Guard it in case the parameters change.
        assert float(np.abs(fb_full[0]).max()) < 1e-6, "DC row must be ~0 to drop bin 0"
        assert float(np.abs(fb_full[-1]).max()) < 1e-6, "Nyquist row must be ~0 to drop it"
        n_used = n_freqs - 2                              # bins 1 .. n_fft/2 - 1
        self.n_freq_pad = _round_up(n_used, 128)          # 256 for n_fft=512

        # Fused, window-folded real-DFT basis [win*cos | -win*sin] (bf16).
        k = np.arange(n_fft)[:, None].astype(np.float64)
        f = np.arange(1, 1 + n_used)[None, :].astype(np.float64)
        ang = 2.0 * np.pi * k * f / n_fft
        basis = np.zeros((n_fft, 2 * self.n_freq_pad), dtype=np.float64)
        basis[:, :n_used] = window[:, None] * np.cos(ang)
        basis[:, self.n_freq_pad:self.n_freq_pad + n_used] = \
            -window[:, None] * np.sin(ang)
        self.basis = jnp.asarray(basis.astype(np.float32), dtype=jnp.bfloat16)

        # Stacked filterbank [fb ; fb] so mel = (y*y) @ fb_stacked (bf16).
        fb_core = fb_full[1:1 + n_used]                   # (n_used, n_mels)
        fbs = np.zeros((2 * self.n_freq_pad, self.n_mels_pad), dtype=np.float32)
        fbs[:n_used, :n_mels] = fb_core
        fbs[self.n_freq_pad:self.n_freq_pad + n_used, :n_mels] = fb_core
        self.fb = jnp.asarray(fbs, dtype=jnp.bfloat16)

    # ----------------------------- framing --------------------------------- #

    def frame(self, x):
        """x: (B, T) waveform -> raw (un-windowed) frames (B, n_frames, n_fft) bf16."""
        B, T = x.shape
        pad = self.n_fft // 2
        xp = jnp.pad(x, ((0, 0), (pad, pad)), mode="reflect")   # center=True
        n_frames = 1 + T // self.hop_length
        idx = (np.arange(n_frames)[:, None] * self.hop_length
               + np.arange(self.n_fft)[None, :])
        frames = xp[:, idx]                                      # (B, n_frames, n_fft)
        # Window is folded into the DFT basis; bf16 halves the frames DMA.
        return frames.astype(jnp.bfloat16), n_frames

    # ----------------------------- forward --------------------------------- #

    def __call__(self, x):
        frames, n_frames = self.frame(x)
        B = frames.shape[0]

        # Frame tile: multiple of 8 sublanes, capped at 512 rows (few-MiB VMEM
        # footprint, safe on v7x's 64 MiB; amortizes per-step pipeline overhead).
        tile = min(512, _round_up(n_frames, 8))
        n_frames_pad = _round_up(n_frames, tile)
        if n_frames_pad != n_frames:
            frames = jnp.pad(frames, ((0, 0), (0, n_frames_pad - n_frames), (0, 0)))
        n_tiles = n_frames_pad // tile

        # Scoped-VMEM budget from the tile (double-buffered blocks + resident
        # constants + live intermediates) with headroom; floor 32 MiB, cap 48 MiB.
        blk = (tile * self.n_fft * 2 + tile * self.n_mels_pad * 4
               + 8 * self.n_mels_pad * 4)
        consts = (self.n_fft * 2 * self.n_freq_pad
                  + 2 * self.n_freq_pad * self.n_mels_pad) * 2
        temps = tile * 2 * self.n_freq_pad * 6 + tile * self.n_mels_pad * 8
        est = 2 * blk + 2 * consts + temps
        vmem_limit = int(min(max(2 * est, 32 << 20), 48 << 20))

        kernel = functools.partial(_mel_kernel, n_frames=n_frames)

        logmel, psums = pl.pallas_call(
            kernel,
            out_shape=(
                jax.ShapeDtypeStruct((B, n_frames_pad, self.n_mels_pad), jnp.float32),
                jax.ShapeDtypeStruct((B, n_tiles, 8, self.n_mels_pad), jnp.float32),
            ),
            grid_spec=pltpu.PrefetchScalarGridSpec(
                num_scalar_prefetch=0,
                grid=(B, n_tiles),
                in_specs=[
                    pl.BlockSpec((1, tile, self.n_fft), lambda b, t: (b, t, 0)),
                    # TODO(synk): single-buffer these grid-invariant constants
                    # (pipeline_mode=pl.Buffered(1)) once that path is verified.
                    pl.BlockSpec((self.n_fft, 2 * self.n_freq_pad),
                                 lambda b, t: (0, 0)),
                    pl.BlockSpec((2 * self.n_freq_pad, self.n_mels_pad),
                                 lambda b, t: (0, 0)),
                ],
                out_specs=(
                    pl.BlockSpec((1, tile, self.n_mels_pad), lambda b, t: (b, t, 0)),
                    pl.BlockSpec((1, 1, 8, self.n_mels_pad),
                                 lambda b, t: (b, t, 0, 0)),
                ),
            ),
            compiler_params=pltpu.CompilerParams(
                dimension_semantics=("parallel", "parallel"),
                vmem_limit_bytes=vmem_limit),
        )(frames, self.basis, self.fb)

        # Fused XLA epilogue: mean over true frames, subtract, unpad, transpose
        # back to the PyTorch layout (B, n_mels, n_frames).
        mean = jnp.sum(psums, axis=(1, 2)) / float(n_frames)     # (B, n_mels_pad)
        out = logmel[:, :n_frames, :self.n_mels] - mean[:, None, :self.n_mels]
        return jnp.transpose(out, (0, 2, 1))

    # ----------------------------- references ------------------------------ #

    def reference_matched(self, x):
        """Pure-JAX reference using the SAME bf16 operands as the kernel
        (tight check of the Pallas plumbing: tiling, masking, mean)."""
        frames, _ = self.frame(x)                                 # bf16
        y = jnp.dot(frames, self.basis, preferred_element_type=jnp.float32)
        power = (y * y).astype(jnp.bfloat16)
        mel = jnp.dot(power, self.fb, preferred_element_type=jnp.float32)
        logmel = jnp.log(mel[..., :self.n_mels] + 1e-6)
        logmel = logmel - jnp.mean(logmel, axis=1, keepdims=True)
        return jnp.transpose(logmel, (0, 2, 1))

    def reference_f32(self, x):
        """Full-precision reference (rfft + f32 filterbank)."""
        B, T = x.shape
        pad = self.n_fft // 2
        xp = jnp.pad(x, ((0, 0), (pad, pad)), mode="reflect")
        n_frames = 1 + T // self.hop_length
        idx = (np.arange(n_frames)[:, None] * self.hop_length
               + np.arange(self.n_fft)[None, :])
        frames = xp[:, idx].astype(jnp.float32) * self.window_f32
        spec = jnp.fft.rfft(frames, n=self.n_fft, axis=-1)
        power = jnp.abs(spec) ** 2                                # (B, n_frames, n_freqs)
        mel = power @ self.fb_f32                                 # (B, n_frames, n_mels)
        logmel = jnp.log(mel + 1e-6)
        logmel = logmel - jnp.mean(logmel, axis=1, keepdims=True)
        return jnp.transpose(logmel, (0, 2, 1))                   # (B, n_mels, n_frames)


# ---------------------------------- main ----------------------------------- #

if __name__ == "__main__":
    key = jax.random.PRNGKey(0)
    # Small input consistent with the module: batch=2, 0.1 s of 16 kHz audio.
    B, T = 2, 1600
    x = 0.1 * jax.random.normal(key, (B, T), dtype=jnp.float32)

    fe = FeatureExtractorPallas(sample_rate=16000, n_fft=512,
                                win_length=0.025, hop_length=0.01, n_mels=80)

    out = jax.block_until_ready(fe(x))
    n_frames = 1 + T // fe.hop_length
    assert out.shape == (B, 80, n_frames)
    assert bool(jnp.all(jnp.isfinite(out)))

    # 1) Matched-precision reference (identical bf16 operands): tight tolerance.
    ref_m = np.asarray(jax.block_until_ready(fe.reference_matched(x)))
    np.testing.assert_allclose(np.asarray(out), ref_m, rtol=2e-2, atol=2e-2)

    # 2) Full-precision rfft reference: validates basis/filterbank construction
    #    (window fold, DC/Nyquist drop).  Loose bounds because the kernel
    #    intentionally runs the DFT with bf16 operands.
    ref_f = np.asarray(jax.block_until_ready(fe.reference_f32(x)))
    err = np.abs(np.asarray(out) - ref_f)
    assert float(err.mean()) < 2e-2 and float(err.max()) < 1.0

    print("KERNEL_OK")
</pallas_src>

<mosaic_0001>
module attributes {stable_mosaic.version = 11 : i64} {
  func.func @_mel_kernel(%arg0: i32, %arg1: i32, %arg2: memref<1x16x512xbf16, #tpu.memory_space<vmem>>, %arg3: memref<512x512xbf16, #tpu.memory_space<vmem>>, %arg4: memref<512x128xbf16, #tpu.memory_space<vmem>>, %arg5: memref<1x16x128xf32, #tpu.memory_space<vmem>>, %arg6: memref<1x1x8x128xf32, #tpu.memory_space<vmem>>) attributes {dimension_semantics = [#tpu.dimension_semantics<parallel>, #tpu.dimension_semantics<parallel>], iteration_bounds = array<i64: 2, 1>, scalar_prefetch = 0 : i64, scratch_operands = 0 : i64, tpu.core_type = #tpu.core_type<tc>, window_params = [{transform_indices = @transform_0, window_bounds = array<i64: 1, 16, 512>}, {pipeline_mode = #tpu.pipeline_mode<synchronous>, transform_indices = @transform_1, window_bounds = array<i64: 512, 512>}, {pipeline_mode = #tpu.pipeline_mode<synchronous>, transform_indices = @transform_2, window_bounds = array<i64: 512, 128>}, {transform_indices = @transform_3, window_bounds = array<i64: 1, 16, 128>}, {transform_indices = @transform_4, window_bounds = array<i64: 1, 1, 8, 128>}]} {
    %c0 = arith.constant 0 : index
    %c0_0 = arith.constant 0 : index
    %c0_1 = arith.constant 0 : index
    %0 = vector.load %arg2[%c0, %c0_0, %c0_1] : memref<1x16x512xbf16, #tpu.memory_space<vmem>>, vector<1x16x512xbf16>
    %1 = vector.shape_cast %0 : vector<1x16x512xbf16> to vector<16x512xbf16>
    %c0_2 = arith.constant 0 : index
    %c0_3 = arith.constant 0 : index
    %2 = vector.load %arg3[%c0_2, %c0_3] : memref<512x512xbf16, #tpu.memory_space<vmem>>, vector<512x512xbf16>
    %cst = arith.constant dense<0.000000e+00> : vector<16x512xf32>
    %3 = tpu.matmul %1, %2, %cst {dimension_numbers = #tpu.dot_dimension_numbers<[1], [0], [0], [1], [0, 0, 1, 1], [], []>} : vector<16x512xbf16>, vector<512x512xbf16>, vector<16x512xf32> -> vector<16x512xf32>
    %4 = arith.mulf %3, %3 : vector<16x512xf32>
    %5 = arith.truncf %4 : vector<16x512xf32> to vector<16x512xbf16>
    %c0_4 = arith.constant 0 : index
    %c0_5 = arith.constant 0 : index
    %6 = vector.load %arg4[%c0_4, %c0_5] : memref<512x128xbf16, #tpu.memory_space<vmem>>, vector<512x128xbf16>
    %cst_6 = arith.constant dense<0.000000e+00> : vector<16x128xf32>
    %7 = tpu.matmul %5, %6, %cst_6 {dimension_numbers = #tpu.dot_dimension_numbers<[1], [0], [0], [1], [0, 0, 1, 1], [], []>} : vector<16x512xbf16>, vector<512x128xbf16>, vector<16x128xf32> -> vector<16x128xf32>
    %cst_7 = arith.constant 9.99999997E-7 : f32
    %8 = vector.broadcast %cst_7 : f32 to vector<16x128xf32>
    %9 = arith.addf %7, %8 : vector<16x128xf32>
    %10 = math.log %9 : vector<16x128xf32>
    %c0_8 = arith.constant 0 : index
    %c0_9 = arith.constant 0 : index
    %c0_10 = arith.constant 0 : index
    %11 = vector.load %arg5[%c0_8, %c0_9, %c0_10] : memref<1x16x128xf32, #tpu.memory_space<vmem>>, vector<1x16x128xf32>
    %12 = vector.shape_cast %11 : vector<1x16x128xf32> to vector<16x128xf32>
    %13 = vector.shape_cast %10 : vector<16x128xf32> to vector<1x16x128xf32>
    tpu.vector_store %arg5[%c0_8, %c0_9, %c0_10], %13 {strides = array<i32>} : memref<1x16x128xf32, #tpu.memory_space<vmem>>, vector<1x16x128xf32>,
    %14 = tpu.iota {dimensions = array<i32: 0>} : vector<16x1xi32>
    %c16_i32 = arith.constant 16 : i32
    %15 = arith.muli %arg1, %c16_i32 : i32
    %16 = vector.broadcast %15 : i32 to vector<16x1xi32>
    %17 = arith.addi %14, %16 : vector<16x1xi32>
    %c11_i32 = arith.constant 11 : i32
    %18 = vector.broadcast %c11_i32 : i32 to vector<16x1xi32>
    %19 = arith.cmpi slt, %17, %18 : vector<16x1xi32>
    %cst_11 = arith.constant 0.000000e+00 : f32
    %20 = vector.shape_cast %19 : vector<16x1xi1> to vector<16x1xi1>
    %21 = vector.broadcast %20 : vector<16x1xi1> to vector<16x128xi1>
    %22 = vector.broadcast %cst_11 : f32 to vector<16x128xf32>
    %23 = arith.select %21, %10, %22 : vector<16x128xi1>, vector<16x128xf32>
    %cst_12 = arith.constant dense<0.000000e+00> : vector<128xf32>
    %24 = vector.multi_reduction <add>, %23, %cst_12 [0] : vector<16x128xf32> to vector<128xf32>
    %25 = vector.shape_cast %24 : vector<128xf32> to vector<1x128xf32>
    %26 = tpu.iota {dimensions = array<i32: 0>} : vector<8x128xi32>
    %c0_i32 = arith.constant 0 : i32
    %27 = vector.broadcast %c0_i32 : i32 to vector<8x128xi32>
    %28 = arith.cmpi eq, %26, %27 : vector<8x128xi32>
    %cst_13 = arith.constant 0.000000e+00 : f32
    %29 = vector.shape_cast %25 : vector<1x128xf32> to vector<1x128xf32>
    %30 = vector.broadcast %29 : vector<1x128xf32> to vector<8x128xf32>
    %31 = vector.broadcast %cst_13 : f32 to vector<8x128xf32>
    %32 = arith.select %28, %30, %31 : vector<8x128xi1>, vector<8x128xf32>
    %c0_14 = arith.constant 0 : index
    %c0_15 = arith.constant 0 : index
    %c0_16 = arith.constant 0 : index
    %c0_17 = arith.constant 0 : index
    %33 = vector.load %arg6[%c0_14, %c0_15, %c0_16, %c0_17] : memref<1x1x8x128xf32, #tpu.memory_space<vmem>>, vector<1x1x8x128xf32>
    %34 = vector.shape_cast %33 : vector<1x1x8x128xf32> to vector<8x128xf32>
    %35 = vector.shape_cast %32 : vector<8x128xf32> to vector<1x1x8x128xf32>
    tpu.vector_store %arg6[%c0_14, %c0_15, %c0_16, %c0_17], %35 {strides = array<i32>} : memref<1x1x8x128xf32, #tpu.memory_space<vmem>>, vector<1x1x8x128xf32>,
    return
  }
  func.func @transform_0(%arg0: i32, %arg1: i32) -> (i32, i32, i32) {
    %c0_i32 = arith.constant 0 : i32
    %c0_i32_0 = arith.constant 0 : i32
    return %arg0, %arg1, %c0_i32 : i32, i32, i32
  }
  func.func @transform_1(%arg0: i32, %arg1: i32) -> (i32, i32) {
    %c0_i32 = arith.constant 0 : i32
    %c0_i32_0 = arith.constant 0 : i32
    %c0_i32_1 = arith.constant 0 : i32
    return %c0_i32, %c0_i32_0 : i32, i32
  }
  func.func @transform_2(%arg0: i32, %arg1: i32) -> (i32, i32) {
    %c0_i32 = arith.constant 0 : i32
    %c0_i32_0 = arith.constant 0 : i32
    %c0_i32_1 = arith.constant 0 : i32
    return %c0_i32, %c0_i32_0 : i32, i32
  }
  func.func @transform_3(%arg0: i32, %arg1: i32) -> (i32, i32, i32) {
    %c0_i32 = arith.constant 0 : i32
    %c0_i32_0 = arith.constant 0 : i32
    return %arg0, %arg1, %c0_i32 : i32, i32, i32
  }
  func.func @transform_4(%arg0: i32, %arg1: i32) -> (i32, i32, i32, i32) {
    %c0_i32 = arith.constant 0 : i32
    %c0_i32_0 = arith.constant 0 : i32
    %c0_i32_1 = arith.constant 0 : i32
    return %arg0, %arg1, %c0_i32, %c0_i32_0 : i32, i32, i32, i32
  }
}

</mosaic_0001>

<bundles_post_ra>
// kernel: tpu_custom_call.1
= control target key start
LH: loop header
LB: loop body
LE: loop exit
PB: predicated region body
PF: predicated region fallthrough
CT: control target
= control target key end

     0   :  { %10 = vsyncpa [#allocation3], 0  ;;  %s2824_s0 = inlined_call_operand.hbm [shape: bf16[2,16,512], index: 0, kind: input, shape index: {}]   ;;  %s2825_s1 = inlined_call_operand.hbm [shape: bf16[512,512], index: 1, kind: input, shape index: {}]   ;;  %s2826_s2 = inlined_call_operand.hbm [shape: bf16[512,128], index: 2, kind: input, shape index: {}]   ;;  %s2827_s3 = inlined_call_operand.hbm [shape: f32[2,16,128], index: 3, kind: output, shape index: {0}]   ;;  %s2828_s4 = inlined_call_operand.hbm [shape: f32[2,1,8,128], index: 4, kind: output, shape index: {1}]  }
   0x1   :  { %12 = vsyncpa [#allocation3 + $0x1], 0 }
   0x2   :  { %13 = vsyncpa [#allocation6], 0 }
   0x3   :  { %14 = vsyncpa [#allocation4], 0 }
   0x4   :  { %16 = vsyncpa [#allocation4 + $0x1], 0 }
   0x5   :  { %17 = vsyncpa [#allocation10], 0 }
   0x6   :  { %19 = vsyncpa [#allocation10 + $0x1], 0  ;;  %s2591_s15 = smov 0   ;;  %s2593_s16 = smov 0  }
   0x7   :  { %s2595_s17 = smov 0   ;;  %s2597_s18 = smov 0  }
   0x8   :  { %s2599_s19 = smov 0   ;;  %s2601_s20 = smov 0  }
   0x9 LB: > { %s1799_s21 = sadd.s32 4294967295, %s2553_s20   ;;  %s1800_s22 = sadd.s32 4294967294, %s2553_s20   ;;  %s2553_s20 = sphi %s2601_s20, %s25_s20   ;;  %s2549_s19 = sphi %s2599_s19, %s2847_s19   ;;  %s2545_s18 = sphi %s2597_s18, %s2846_s18   ;;  %s2541_s17 = sphi %s2595_s17, %s2845_s17   ;;  %s2537_s16 = sphi %s2593_s16, %s2844_s16   ;;  %s2533_s15 = sphi %s2591_s15, %s2843_s15  }
   0xa   : > { %p59_p0 = scmp.ne.s32.totalorder %s2537_s16, %s2533_s15  ;;  %p2625_p1 = scmp.eq.s32.totalorder %s1799_s21, 0 }
   0xb   : > { %p2629_p2 = scmp.eq.s32.totalorder %s1799_s21, 1  ;;  %p133_p3 = scmp.eq.s32.totalorder %s1800_s22, 1 }
   0xc   : > { %p2635_p4 = por %p2625_p1, %p59_p0  ;;  %p1801_p5 = scmp.ge.s32.totalorder %s2553_s20, 1 }
   0xd   : > { %p2640_p6 = por %p133_p3, %p59_p0  ;;  %p168_p7 = scmp.lt.s32.totalorder %s2553_s20, 3 }
   0xe   : > { %s2555_s28 = smov [#allocation5]   ;;  %s2556_s5 = smov [#allocation7]  }
   0xf   : > { %s2834_s26 = scalar_select %p2640_p6, 1, 0 }
  0x10   : > { %p2645_p8 = pnand %p1801_p5, %p168_p7  ;;  %s180_s29 = sshll.u32 %s2555_s28, 4  ;;  %s181_s29 = int_to_ptr.vmem [resolvable:$true] %s180_s29 }
  0x11   : > { %s193_s6 = sshll.u32 %s2556_s5, 4  ;;  %s2370_s7 = scalar_lea.vmem %s181_s29, 16384  ;;  %s194_s6 = int_to_ptr.vmem [resolvable:$true] %s193_s6 }
  0x12   : > { %p2045_p9 = pneg %p2645_p8  ;;  %p2371_p13 = scmp.ne.s32.totalorder %s181_s29, %s2370_s7 }
  0x13   : > { %p2378_p5 = scmp.lt.s32.totalorder %s181_s29, %s181_s29  ;;  %p2379_p7 = scmp.lt.s32.totalorder %s2370_s7, %s2370_s7 }
  0x14   : > { %p2654_p11 = pnand %p2045_p9, %p2625_p1 }
  0x15   : > { %p2380_p10 = por %p2379_p7, %p2378_p5 }
  0x16   : > { %p2361_p12 = pneg %p2654_p11 }
  0x18   : > { %p2373_p0 = pnand %p2371_p13, %p2361_p12 }
  0x1a   : > { %p2374_p3 = pneg %p2373_p0 }
  0x1c   : > { %p2381_p9 = pnand %p2380_p10, %p2374_p3 }
  0x1e   : > { %2384 = shalt.err (!%p2381_p9)
}
  0x1f   : > { %s2829_s8 = smov 256   ;;  %s2830_s9 = smov 16  }
  0x20   : > { %2048 = dma.hbm_to_vmem [thread:$0]  (!%p2654_p11), %s2825_s1, 16384, %s181_s29, [#allocation6], %s2829_s8, %s2829_s8, %s2830_s9  }
  0x21   : > { %s2396_s12 = scalar_lea.vmem %s194_s6, 4096  ;;  %p2404_p10 = scmp.lt.s32.totalorder %s194_s6, %s194_s6 }
  0x22   : > { %p2397_p13 = scmp.ne.s32.totalorder %s194_s6, %s2396_s12  ;;  %p2405_p3 = scmp.lt.s32.totalorder %s2396_s12, %s2396_s12 }
  0x24   : > { %p2399_p0 = pnand %p2397_p13, %p2361_p12  ;;  %p2406_p7 = por %p2405_p3, %p2404_p10 }
  0x26   : > { %p2400_p5 = pneg %p2399_p0 }
  0x28   : > { %p2407_p9 = pnand %p2406_p7, %p2400_p5 }
  0x2a   : > { %2410 = shalt.err (!%p2407_p9)
}
  0x2b   : > { %s2559_s13 = smov 64   ;;  %s2560_s14 = smov 4  }
  0x2c   : > { %2051 = dma.hbm_to_vmem [thread:$0]  (!%p2654_p11), %s2826_s2, 4096, %s194_s6, [#allocation6], %s2559_s13, %s2559_s13, %s2560_s14  }
  0x2d   : > { %s37_s28 = sadd.s32 1, %s2549_s19  ;;  %s46_s29 = sadd.s32 1, %s2541_s17 }
  0x2e   : > { %p39_p12 = scmp.ge.s32.totalorder %s37_s28, 2  ;;  %p53_p13 = scmp.ne.s32.totalorder %s2541_s17, %s2537_s16 }
  0x2f   : > { %p54_p0 = scmp.eq.s32.totalorder %s2553_s20, 0  ;;  %p2065_p5 = scmp.lt.s32.totalorder %s2553_s20, 2 }
  0x30   : > { %s2849_s28 = smov (%p39_p12, %s37_s28), 0  ;;  %p2689_p3 = por %p2629_p2, %p53_p13 }
  0x31   : > { %p55_p10 = por %p54_p0, %p53_p13  ;;  %s41_s30 = ssub.s32 %s2549_s19, %s2849_s28 }
  0x32   : > { %s207_s7 = sand.u32 1, %s2541_s17   ;;  %p44_p7 = scmp.eq.s32.totalorder %s41_s30, 0 }
  0x33   : > { %s1805_s6 = sshll.u32 %s207_s7, 5  ;;  %s1985_s10 = sshll.u32 %s2549_s19, 9 }
  0x34   : > { %s2698_s11 = scalar_select %p44_p7, %s2541_s17, %s46_s29  }
  0x35   : > { %s220_s14 = scalar_lea.hbm %s2824_s0, %s1985_s10  ;;  %s211_s21 = scalar_lea.vmem [#allocation2], %s1805_s6 }
  0x36   : > { %s221_s22 = sshll.u32 %s211_s21, 4  ;;  %p2705_p11 = pnand %p2065_p5, %p55_p10  ;;  %s222_s22 = int_to_ptr.vmem [resolvable:$true] %s221_s22 }
  0x37   : > { %s208_s8 = scalar_lea.sflag [#allocation3], %s207_s7  ;;  %s2424_s30 = scalar_lea.vmem %s222_s22, 512 }
  0x38   : > { %p2413_p2 = pneg %p2705_p11  ;;  %p2425_p9 = scmp.ne.s32.totalorder %s222_s22, %s2424_s30 }
  0x39   : > { %s2561_s29 = smov [#allocation2]  }
  0x3a   : > { %p2427_p12 = pnand %p2425_p9, %p2413_p2  ;;  %s2429_s9 = sshll.u32 %s2561_s29, 4  ;;  %s2430_s9 = int_to_ptr.vmem [resolvable:$false] %s2429_s9 }
  0x3b   : > { %s2431_s10 = scalar_lea.vmem %s2430_s9, 1024  ;;  %p2432_p0 = scmp.lt.s32.totalorder %s222_s22, %s2430_s9 }
  0x3c   : > { %p2428_p13 = pneg %p2427_p12  ;;  %p2433_p7 = scmp.lt.s32.totalorder %s2431_s10, %s2424_s30 }
  0x3e   : > { %p2434_p6 = por %p2433_p7, %p2432_p0 }
  0x40   : > { %p2435_p5 = pnand %p2434_p6, %p2428_p13 }
  0x42   : > { %2438 = shalt.err (!%p2435_p5)
}
  0x43   : > { %s2839_s6 = smov 16   ;;  %s2840_s12 = smov 256  }
  0x44   : > { %2055 = dma.hbm_to_vmem [thread:$0]  (!%p2705_p11), %s220_s14, 512, %s222_s22, %s208_s8, %s2840_s12, %s2840_s12, %s2839_s6  }
  0x45   : > { %233 = sbr.rel (%p2645_p8) target bundleno = 671 (0x29f), region = 32  ;;  %s2719_s7 = sand.u32 (!%p2645_p8), 1, %s2537_s16  }
  0x46   : > { %s1809_s9 = sshll.u32 (!%p2645_p8), %s2719_s7, 5  ;;  %s236_s13 = scalar_lea.sflag (!%p2645_p8), [#allocation3], %s2719_s7 }
  0x47   : > { %s2723_s21 = scalar_lea.vmem (!%p2645_p8), [#allocation2], %s1809_s9 }
  0x4a   : > { %2516 = dma.done.wait (%p2635_p4), %s236_s13, 512  }
  0x4b   : > { %2518 = vsyncadd (%p2635_p4), %s236_s13, 4294966784 }
  0x4c   : > { %2520 = dma.done.wait (%p2625_p1), [#allocation6], 20480  }
  0x4d   : > { %2522 = vsyncadd (%p2625_p1), [#allocation6], 4294946816  ;;  %v2125_v0 = vld [vmem:[#allocation5 + $0xe4] ss:$16 sps:$4 sm:$0xff]   ;;  %v2129_v2 = vld [vmem:[#allocation5 + $0xe0] ss:$16 sps:$4 sm:$0xff]  }
  0x4e   : > { %v2127_v1 = vld [vmem:[#allocation5 + $0x2e4] ss:$16 sps:$4 sm:$0xff]   ;;  %1072 = vmatprep.subr.bf16.mxu0 %v2125_v0  ;;  %v2130_v3 = vld [vmem:[#allocation5 + $0x2e0] ss:$16 sps:$4 sm:$0xff]   ;;  %v2226_v51 = vld [vmem:[%s2723_s21 + $0xc] ss:$16 sps:$4 sm:$0xff]  }
  0x4f   : > { %1115 = vmatprep.subr.bf16.mxu1 %v2127_v1  ;;  %v2131_v4 = vld [vmem:[#allocation5 + $0xc4] ss:$16 sps:$4 sm:$0xff]   ;;  %1073 = vmatpush1.bf16.msra.mxu0 %v2129_v2  ;;  %v2135_v6 = vld [vmem:[#allocation5 + $0xc0] ss:$16 sps:$4 sm:$0xff]   ;;  %v2229_v2 = vld [vmem:[#allocation5 + $0xec] ss:$16 sps:$4 sm:$0xff]  }
  0x50   : > { %1116 = vmatpush1.bf16.msra.mxu1 %v2130_v3  ;;  %v2133_v5 = vld [vmem:[#allocation5 + $0x2c4] ss:$16 sps:$4 sm:$0xff]   ;;  %1074 = vmatprep.subr.bf16.mxu0 %v2131_v4  ;;  %v2136_v7 = vld [vmem:[#allocation5 + $0x2c0] ss:$16 sps:$4 sm:$0xff]   ;;  %v2232_v3 = vld [vmem:[#allocation5 + $0x2ec] ss:$16 sps:$4 sm:$0xff]  }
  0x51   : > { %1117 = vmatprep.subr.bf16.mxu1 %v2133_v5  ;;  %v2137_v8 = vld [vmem:[#allocation5 + $0xa4] ss:$16 sps:$4 sm:$0xff]   ;;  %v2141_v10 = vld [vmem:[#allocation5 + $0xa0] ss:$16 sps:$4 sm:$0xff]   ;;  %1147 = vmatprep.mubr.bf16.mxu1 %v2226_v51  ;;  %v2739_v5 = vld [vmem:[%s2723_s21 + $0x8] ss:$16 sps:$4 sm:$0xff]  }
  0x52   : > { %v2139_v9 = vld [vmem:[#allocation5 + $0x2a4] ss:$16 sps:$4 sm:$0xff]   ;;  %v2142_v11 = vld [vmem:[#allocation5 + $0x2a0] ss:$16 sps:$4 sm:$0xff]   ;;  %s1812_s23 = sshll.u32 %s2719_s7, 4  ;;  %s1986_s8 = sshll.u32 %s2545_s18, 8 }
  0x53   : > { %1075 = vmatpush1.bf16.msra.mxu0 %v2135_v6  ;;  %v2143_v12 = vld [vmem:[#allocation5 + $0x84] ss:$16 sps:$4 sm:$0xff]   ;;  %v2147_v14 = vld [vmem:[#allocation5 + $0x80] ss:$16 sps:$4 sm:$0xff]   ;;  %v2227_v6 = vld [vmem:[#allocation5 + $0xe8] ss:$16 sps:$4 sm:$0xff]   ;;  %s2750_s24 = scalar_lea.hbm %s2827_s3, %s1986_s8 }
  0x54   : > { %1118 = vmatpush1.bf16.msra.mxu1 %v2136_v7  ;;  %1076 = vmatprep.subr.bf16.mxu0 %v2137_v8  ;;  %v2145_v13 = vld [vmem:[#allocation5 + $0x284] ss:$16 sps:$4 sm:$0xff]   ;;  %v2148_v15 = vld [vmem:[#allocation5 + $0x280] ss:$16 sps:$4 sm:$0xff]   ;;  %v2230_v7 = vld [vmem:[#allocation5 + $0x2e8] ss:$16 sps:$4 sm:$0xff]  }
  0x55   : > { %1119 = vmatprep.subr.bf16.mxu1 %v2139_v9  ;;  %v2149_v16 = vld [vmem:[#allocation5 + $0x64] ss:$16 sps:$4 sm:$0xff]   ;;  %v2153_v18 = vld [vmem:[#allocation5 + $0x60] ss:$16 sps:$4 sm:$0xff]   ;;  %v2235_v8 = vld [vmem:[#allocation5 + $0xcc] ss:$16 sps:$4 sm:$0xff]  }
  0x56   : > { %v2151_v17 = vld [vmem:[#allocation5 + $0x264] ss:$16 sps:$4 sm:$0xff]   ;;  %v2154_v19 = vld [vmem:[#allocation5 + $0x260] ss:$16 sps:$4 sm:$0xff]   ;;  %v2238_v9 = vld [vmem:[#allocation5 + $0x2cc] ss:$16 sps:$4 sm:$0xff]  }
  0x57   : > { %1077 = vmatpush1.bf16.msra.mxu0 %v2141_v10  ;;  %v2155_v20 = vld [vmem:[#allocation5 + $0x44] ss:$16 sps:$4 sm:$0xff]   ;;  %v2159_v22 = vld [vmem:[#allocation5 + $0x40] ss:$16 sps:$4 sm:$0xff]   ;;  %v2233_v10 = vld [vmem:[#allocation5 + $0xc8] ss:$16 sps:$4 sm:$0xff]  }
  0x58   : > { %1120 = vmatpush1.bf16.msra.mxu1 %v2142_v11  ;;  %1078 = vmatprep.subr.bf16.mxu0 %v2143_v12  ;;  %v2157_v21 = vld [vmem:[#allocation5 + $0x244] ss:$16 sps:$4 sm:$0xff]   ;;  %v2160_v23 = vld [vmem:[#allocation5 + $0x240] ss:$16 sps:$4 sm:$0xff]   ;;  %v2236_v11 = vld [vmem:[#allocation5 + $0x2c8] ss:$16 sps:$4 sm:$0xff]  }
  0x59   : > { %1121 = vmatprep.subr.bf16.mxu1 %v2145_v13  ;;  %v2161_v24 = vld [vmem:[#allocation5 + $0x24] ss:$16 sps:$4 sm:$0xff]   ;;  %v2165_v26 = vld [vmem:[#allocation5 + $0x20] ss:$16 sps:$4 sm:$0xff]   ;;  %v2241_v12 = vld [vmem:[#allocation5 + $0xac] ss:$16 sps:$4 sm:$0xff]  }
  0x5a   : > { %v2163_v25 = vld [vmem:[#allocation5 + $0x224] ss:$16 sps:$4 sm:$0xff]   ;;  %v2166_v27 = vld [vmem:[#allocation5 + $0x220] ss:$16 sps:$4 sm:$0xff]   ;;  %v2244_v13 = vld [vmem:[#allocation5 + $0x2ac] ss:$16 sps:$4 sm:$0xff]  }
  0x5b   : > { %1079 = vmatpush1.bf16.msra.mxu0 %v2147_v14  ;;  %v2167_v28 = vld [vmem:[#allocation5 + $0x4] ss:$16 sps:$4 sm:$0xff]   ;;  %v2171_v30 = vld [vmem:[#allocation5] ss:$16 sps:$4 sm:$0xff]   ;;  %v2239_v14 = vld [vmem:[#allocation5 + $0xa8] ss:$16 sps:$4 sm:$0xff]  }
  0x5c   : > { %1122 = vmatpush1.bf16.msra.mxu1 %v2148_v15  ;;  %1080 = vmatprep.subr.bf16.mxu0 %v2149_v16  ;;  %v2169_v29 = vld [vmem:[#allocation5 + $0x204] ss:$16 sps:$4 sm:$0xff]   ;;  %v2172_v31 = vld [vmem:[#allocation5 + $0x200] ss:$16 sps:$4 sm:$0xff]   ;;  %v2242_v15 = vld [vmem:[#allocation5 + $0x2a8] ss:$16 sps:$4 sm:$0xff]  }
  0x5d   : > { %1123 = vmatprep.subr.bf16.mxu1 %v2151_v17  ;;  %v2173_v32 = vld [vmem:[#allocation5 + $0x1e4] ss:$16 sps:$4 sm:$0xff]   ;;  %v2177_v34 = vld [vmem:[#allocation5 + $0x1e0] ss:$16 sps:$4 sm:$0xff]   ;;  %v2247_v16 = vld [vmem:[#allocation5 + $0x8c] ss:$16 sps:$4 sm:$0xff]  }
  0x5e   : > { %v2175_v33 = vld [vmem:[#allocation5 + $0x3e4] ss:$16 sps:$4 sm:$0xff]   ;;  %v2178_v35 = vld [vmem:[#allocation5 + $0x3e0] ss:$16 sps:$4 sm:$0xff]   ;;  %v2250_v17 = vld [vmem:[#allocation5 + $0x28c] ss:$16 sps:$4 sm:$0xff]  }
  0x5f   : > { %1081 = vmatpush1.bf16.msra.mxu0 %v2153_v18  ;;  %v2179_v36 = vld [vmem:[#allocation5 + $0x1c4] ss:$16 sps:$4 sm:$0xff]   ;;  %v2183_v38 = vld [vmem:[#allocation5 + $0x1c0] ss:$16 sps:$4 sm:$0xff]   ;;  %v2245_v18 = vld [vmem:[#allocation5 + $0x88] ss:$16 sps:$4 sm:$0xff]  }
  0x60   : > { %1124 = vmatpush1.bf16.msra.mxu1 %v2154_v19  ;;  %1082 = vmatprep.subr.bf16.mxu0 %v2155_v20  ;;  %v2181_v37 = vld [vmem:[#allocation5 + $0x3c4] ss:$16 sps:$4 sm:$0xff]   ;;  %v2184_v39 = vld [vmem:[#allocation5 + $0x3c0] ss:$16 sps:$4 sm:$0xff]   ;;  %v2248_v19 = vld [vmem:[#allocation5 + $0x288] ss:$16 sps:$4 sm:$0xff]  }
  0x61   : > { %1125 = vmatprep.subr.bf16.mxu1 %v2157_v21  ;;  %v2185_v40 = vld [vmem:[#allocation5 + $0x1a4] ss:$16 sps:$4 sm:$0xff]   ;;  %v2189_v42 = vld [vmem:[#allocation5 + $0x1a0] ss:$16 sps:$4 sm:$0xff]   ;;  %v2253_v20 = vld [vmem:[#allocation5 + $0x6c] ss:$16 sps:$4 sm:$0xff]  }
  0x62   : > { %v2187_v41 = vld [vmem:[#allocation5 + $0x3a4] ss:$16 sps:$4 sm:$0xff]   ;;  %v2190_v43 = vld [vmem:[#allocation5 + $0x3a0] ss:$16 sps:$4 sm:$0xff]   ;;  %v2256_v21 = vld [vmem:[#allocation5 + $0x26c] ss:$16 sps:$4 sm:$0xff]  }
  0x63   : > { %1083 = vmatpush1.bf16.msra.mxu0 %v2159_v22  ;;  %v2191_v44 = vld [vmem:[#allocation5 + $0x184] ss:$16 sps:$4 sm:$0xff]   ;;  %v2195_v46 = vld [vmem:[#allocation5 + $0x180] ss:$16 sps:$4 sm:$0xff]   ;;  %v2251_v22 = vld [vmem:[#allocation5 + $0x68] ss:$16 sps:$4 sm:$0xff]  }
  0x64   : > { %1126 = vmatpush1.bf16.msra.mxu1 %v2160_v23  ;;  %1084 = vmatprep.subr.bf16.mxu0 %v2161_v24  ;;  %v2193_v45 = vld [vmem:[#allocation5 + $0x384] ss:$16 sps:$4 sm:$0xff]   ;;  %v2196_v47 = vld [vmem:[#allocation5 + $0x380] ss:$16 sps:$4 sm:$0xff]   ;;  %v2254_v23 = vld [vmem:[#allocation5 + $0x268] ss:$16 sps:$4 sm:$0xff]  }
  0x65   : > { %1127 = vmatprep.subr.bf16.mxu1 %v2163_v25  ;;  %v2197_v48 = vld [vmem:[#allocation5 + $0x164] ss:$16 sps:$4 sm:$0xff]   ;;  %v2201_v52 = vld [vmem:[#allocation5 + $0x160] ss:$16 sps:$4 sm:$0xff]   ;;  %v2259_v24 = vld [vmem:[#allocation5 + $0x4c] ss:$16 sps:$4 sm:$0xff]  }
  0x66   : > { %v2223_v49 = vld [vmem:[%s2723_s21 + $0x4] ss:$16 sps:$4 sm:$0xff]   ;;  %v2202_v53 = vld [vmem:[#allocation5 + $0x360] ss:$16 sps:$4 sm:$0xff]   ;;  %v2262_v25 = vld [vmem:[#allocation5 + $0x24c] ss:$16 sps:$4 sm:$0xff]  }
  0x67   : > { %1085 = vmatpush1.bf16.msra.mxu0 %v2165_v26  ;;  %v2199_v50 = vld [vmem:[#allocation5 + $0x364] ss:$16 sps:$4 sm:$0xff]   ;;  %1104 = vmatprep.mubr.bf16.mxu0 %v2223_v49  ;;  %v2207_v56 = vld [vmem:[#allocation5 + $0x140] ss:$16 sps:$4 sm:$0xff]   ;;  %v2257_v26 = vld [vmem:[#allocation5 + $0x48] ss:$16 sps:$4 sm:$0xff]  }
  0x68   : > { %1128 = vmatpush1.bf16.msra.mxu1 %v2166_v27  ;;  %1086 = vmatprep.subr.bf16.mxu0 %v2167_v28  ;;  %v2203_v54 = vld [vmem:[#allocation5 + $0x144] ss:$16 sps:$4 sm:$0xff]   ;;  %v2208_v57 = vld [vmem:[#allocation5 + $0x340] ss:$16 sps:$4 sm:$0xff]   ;;  %v2260_v27 = vld [vmem:[#allocation5 + $0x248] ss:$16 sps:$4 sm:$0xff]  }
  0x69   : > { %1129 = vmatprep.subr.bf16.mxu1 %v2169_v29  ;;  %v2205_v55 = vld [vmem:[#allocation5 + $0x344] ss:$16 sps:$4 sm:$0xff]   ;;  %v2213_v60 = vld [vmem:[#allocation5 + $0x120] ss:$16 sps:$4 sm:$0xff]   ;;  %v2265_v28 = vld [vmem:[#allocation5 + $0x2c] ss:$16 sps:$4 sm:$0xff]  }
  0x6a   : > { %v2209_v58 = vld [vmem:[#allocation5 + $0x124] ss:$16 sps:$4 sm:$0xff]   ;;  %v2214_v61 = vld [vmem:[#allocation5 + $0x320] ss:$16 sps:$4 sm:$0xff]   ;;  %v2268_v29 = vld [vmem:[#allocation5 + $0x22c] ss:$16 sps:$4 sm:$0xff]  }
  0x6b   : > { %1087 = vmatpush1.bf16.msra.mxu0 %v2171_v30  ;;  %v2211_v59 = vld [vmem:[#allocation5 + $0x324] ss:$16 sps:$4 sm:$0xff]   ;;  %v2219_v0 = vld [vmem:[#allocation5 + $0x100] ss:$16 sps:$4 sm:$0xff]   ;;  %v2263_v30 = vld [vmem:[#allocation5 + $0x28] ss:$16 sps:$4 sm:$0xff]  }
  0x6c   : > { %1130 = vmatpush1.bf16.msra.mxu1 %v2172_v31  ;;  %1088 = vmatprep.subr.bf16.mxu0 %v2173_v32  ;;  %v2215_v62 = vld [vmem:[#allocation5 + $0x104] ss:$16 sps:$4 sm:$0xff]   ;;  %v2220_v1 = vld [vmem:[#allocation5 + $0x300] ss:$16 sps:$4 sm:$0xff]   ;;  %v2266_v31 = vld [vmem:[#allocation5 + $0x228] ss:$16 sps:$4 sm:$0xff]  }
  0x6d   : > { %1131 = vmatprep.subr.bf16.mxu1 %v2175_v33  ;;  %v2217_v63 = vld [vmem:[#allocation5 + $0x304] ss:$16 sps:$4 sm:$0xff]   ;;  %v2736_v4 = vld [vmem:[%s2723_s21] ss:$16 sps:$4 sm:$0xff]   ;;  %v2271_v32 = vld [vmem:[#allocation5 + $0xc] ss:$16 sps:$4 sm:$0xff]  }
  0x6e   : > { %v2274_v33 = vld [vmem:[#allocation5 + $0x20c] ss:$16 sps:$4 sm:$0xff]   ;;  %s269_s25 = scalar_lea.vmem [#allocation8], %s1812_s23  ;;  %s1626_s30 = scalar_lea.sflag [#allocation4], %s2719_s7 }
  0x6f   : > { %1089 = vmatpush2.bf16.msra.mxu0 %v2177_v34  ;;  %v2269_v34 = vld [vmem:[#allocation5 + $0x8] ss:$16 sps:$4 sm:$0xff]   ;;  %s1646_s27 = sshll.u32 %s269_s25, 4  ;;  %s2562_s10 = smov [#allocation8]   ;;  %s2752_s27 = int_to_ptr.vmem [resolvable:$true] %s1646_s27 }
  0x70   : > { %1132 = vmatpush2.bf16.msra.mxu1 %v2178_v35  ;;  %1090 = vmatprep.subr.bf16.mxu0 %v2179_v36  ;;  %v2272_v35 = vld [vmem:[#allocation5 + $0x208] ss:$16 sps:$4 sm:$0xff]   ;;  %v2277_v36 = vld [vmem:[#allocation5 + $0x1ec] ss:$16 sps:$4 sm:$0xff]   ;;  %s2439_s29 = scalar_lea.vmem %s2752_s27, 256  ;;  %s2443_s6 = sshll.u32 %s2562_s10, 4  ;;  %s2444_s6 = int_to_ptr.vmem [resolvable:$false] %s2443_s6 }
  0x71   : > { %1133 = vmatprep.subr.bf16.mxu1 %v2181_v37  ;;  %v2280_v37 = vld [vmem:[#allocation5 + $0x3ec] ss:$16 sps:$4 sm:$0xff]   ;;  %p2440_p1 = scmp.ne.s32.totalorder %s2752_s27, %s2439_s29  ;;  %s2445_s12 = scalar_lea.vmem %s2444_s6, 512 }
  0x72   : > { %p2446_p8 = scmp.lt.s32.totalorder %s2752_s27, %s2444_s6  ;;  %p2447_p10 = scmp.lt.s32.totalorder %s2445_s12, %s2439_s29 }
  0x73   : > { %1091 = vmatpush2.bf16.msra.mxu0 %v2183_v38  ;;  %v2275_v38 = vld [vmem:[#allocation5 + $0x1e8] ss:$16 sps:$4 sm:$0xff]   ;;  %p2441_p4 = pnand %p2440_p1, %p2689_p3 }
  0x74   : > { %1134 = vmatpush2.bf16.msra.mxu1 %v2184_v39  ;;  %1092 = vmatprep.subr.bf16.mxu0 %v2185_v40  ;;  %v2278_v39 = vld [vmem:[#allocation5 + $0x3e8] ss:$16 sps:$4 sm:$0xff]   ;;  %v2283_v40 = vld [vmem:[#allocation5 + $0x1cc] ss:$16 sps:$4 sm:$0xff]   ;;  %p2448_p11 = por %p2447_p10, %p2446_p8 }
  0x75   : > { %1135 = vmatprep.subr.bf16.mxu1 %v2187_v41  ;;  %v2286_v41 = vld [vmem:[#allocation5 + $0x3cc] ss:$16 sps:$4 sm:$0xff]   ;;  %p2442_p6 = pneg %p2441_p4 }
  0x77   : > { %1093 = vmatpush2.bf16.msra.mxu0 %v2189_v42  ;;  %v2281_v42 = vld [vmem:[#allocation5 + $0x1c8] ss:$16 sps:$4 sm:$0xff]   ;;  %p2449_p2 = pnand %p2448_p11, %p2442_p6 }
  0x78   : > { %1136 = vmatpush2.bf16.msra.mxu1 %v2190_v43  ;;  %1094 = vmatprep.subr.bf16.mxu0 %v2191_v44  ;;  %v2284_v43 = vld [vmem:[#allocation5 + $0x3c8] ss:$16 sps:$4 sm:$0xff]   ;;  %v2289_v44 = vld [vmem:[#allocation5 + $0x1ac] ss:$16 sps:$4 sm:$0xff]  }
  0x79   : > { %1137 = vmatprep.subr.bf16.mxu1 %v2193_v45  ;;  %v2292_v45 = vld [vmem:[#allocation5 + $0x3ac] ss:$16 sps:$4 sm:$0xff]  }
  0x7b   : > { %1095 = vmatpush2.bf16.msra.mxu0 %v2195_v46  ;;  %v2287_v46 = vld [vmem:[#allocation5 + $0x1a8] ss:$16 sps:$4 sm:$0xff]  }
  0x7c   : > { %1138 = vmatpush2.bf16.msra.mxu1 %v2196_v47  ;;  %1096 = vmatprep.subr.bf16.mxu0 %v2197_v48  ;;  %v2290_v47 = vld [vmem:[#allocation5 + $0x3a8] ss:$16 sps:$4 sm:$0xff]   ;;  %v2295_v48 = vld [vmem:[#allocation5 + $0x18c] ss:$16 sps:$4 sm:$0xff]  }
  0x7d   : > { %1139 = vmatprep.subr.bf16.mxu1 %v2199_v50  ;;  %v2293_v50 = vld [vmem:[#allocation5 + $0x188] ss:$16 sps:$4 sm:$0xff]  }
  0x7f   : > { %1097 = vmatpush2.bf16.msra.mxu0 %v2201_v52  ;;  %v2301_v52 = vld [vmem:[#allocation5 + $0x16c] ss:$16 sps:$4 sm:$0xff]  }
  0x80   : > { %1140 = vmatpush2.bf16.msra.mxu1 %v2202_v53  ;;  %1098 = vmatprep.subr.bf16.mxu0 %v2203_v54  ;;  %v2304_v53 = vld [vmem:[#allocation5 + $0x36c] ss:$16 sps:$4 sm:$0xff]   ;;  %v2299_v54 = vld [vmem:[#allocation5 + $0x168] ss:$16 sps:$4 sm:$0xff]  }
  0x81   : > { %1141 = vmatprep.subr.bf16.mxu1 %v2205_v55  ;;  %v2302_v55 = vld [vmem:[#allocation5 + $0x368] ss:$16 sps:$4 sm:$0xff]  }
  0x83   : > { %1099 = vmatpush2.bf16.msra.mxu0 %v2207_v56  ;;  %v2307_v56 = vld [vmem:[#allocation5 + $0x14c] ss:$16 sps:$4 sm:$0xff]  }
  0x84   : > { %1142 = vmatpush2.bf16.msra.mxu1 %v2208_v57  ;;  %1100 = vmatprep.subr.bf16.mxu0 %v2209_v58  ;;  %v2310_v57 = vld [vmem:[#allocation5 + $0x34c] ss:$16 sps:$4 sm:$0xff]   ;;  %v2305_v58 = vld [vmem:[#allocation5 + $0x148] ss:$16 sps:$4 sm:$0xff]  }
  0x85   : > { %1143 = vmatprep.subr.bf16.mxu1 %v2211_v59  ;;  %v2308_v59 = vld [vmem:[#allocation5 + $0x348] ss:$16 sps:$4 sm:$0xff]  }
  0x87   : > { %1101 = vmatpush2.bf16.msra.mxu0 %v2213_v60  ;;  %v2313_v60 = vld [vmem:[#allocation5 + $0x12c] ss:$16 sps:$4 sm:$0xff]  }
  0x88   : > { %1144 = vmatpush2.bf16.msra.mxu1 %v2214_v61  ;;  %1102 = vmatprep.subr.bf16.mxu0 %v2215_v62  ;;  %v2316_v61 = vld [vmem:[#allocation5 + $0x32c] ss:$16 sps:$4 sm:$0xff]   ;;  %v2311_v62 = vld [vmem:[#allocation5 + $0x128] ss:$16 sps:$4 sm:$0xff]  }
  0x89   : > { %1145 = vmatprep.subr.bf16.mxu1 %v2217_v63  ;;  %v2314_v63 = vld [vmem:[#allocation5 + $0x328] ss:$16 sps:$4 sm:$0xff]  }
  0x8b   : > { %1103 = vmatpush2.bf16.msra.mxu0 %v2219_v0  ;;  %v2319_v0 = vld [vmem:[#allocation5 + $0x10c] ss:$16 sps:$4 sm:$0xff]  }
  0x8c   : > { %1146 = vmatpush2.bf16.msra.mxu1 %v2220_v1  ;;  %1158 = vmatprep.subr.bf16.mxu0 %v2229_v2  ;;  %v2322_v1 = vld [vmem:[#allocation5 + $0x30c] ss:$16 sps:$4 sm:$0xff]   ;;  %v2317_v2 = vld [vmem:[#allocation5 + $0x108] ss:$16 sps:$4 sm:$0xff]  }
  0x8d   : > { %1201 = vmatprep.subr.bf16.mxu1 %v2232_v3  ;;  %v2320_v3 = vld [vmem:[#allocation5 + $0x308] ss:$16 sps:$4 sm:$0xff]  }
  0x8e   : > { %1105 = vmatmul.mubr.bf16.vlgmr.msra.gmra.mxu0 %v2736_v4 }
  0x8f   : > { %1148 = vmatmul.mubr.bf16.vlgmr.msra.gmra.mxu1 %v2739_v5  ;;  %1159 = vmatpush1.bf16.msra.mxu0 %v2227_v6  ;;  %v2323_v6 = vld [vmem:[#allocation7 + $0x78] sm:$0xff]  }
  0x90   : > { %1202 = vmatpush1.bf16.msra.mxu1 %v2230_v7  ;;  %1160 = vmatprep.subr.bf16.mxu0 %v2235_v8  ;;  %v2324_v7 = vld [vmem:[#allocation7 + $0x38] sm:$0xff]   ;;  %v2325_v8 = vld [vmem:[#allocation7 + $0x70] sm:$0xff]  }
  0x91   : > { %1203 = vmatprep.subr.bf16.mxu1 %v2238_v9  ;;  %1190 = vmatprep.mubr.bf16.mxu0 %v2223_v49  ;;  %v2298_v49 = vld [vmem:[#allocation5 + $0x38c] ss:$16 sps:$4 sm:$0xff]   ;;  %v2326_v9 = vld [vmem:[#allocation7 + $0x30] sm:$0xff]  }
  0x92   : > { %1233 = vmatprep.mubr.bf16.mxu1 %v2226_v51  ;;  %v2296_v51 = vld [vmem:[#allocation5 + $0x388] ss:$16 sps:$4 sm:$0xff]  }
  0x93   : > { %1161 = vmatpush1.bf16.msra.mxu0 %v2233_v10  ;;  %v2327_v10 = vld [vmem:[#allocation7 + $0x68] sm:$0xff]  }
  0x94   : > { %1204 = vmatpush1.bf16.msra.mxu1 %v2236_v11  ;;  %1162 = vmatprep.subr.bf16.mxu0 %v2241_v12  ;;  %v2328_v11 = vld [vmem:[#allocation7 + $0x28] sm:$0xff]   ;;  %v2329_v12 = vld [vmem:[#allocation7 + $0x60] sm:$0xff]  }
  0x95   : > { %1205 = vmatprep.subr.bf16.mxu1 %v2244_v13  ;;  %v2330_v13 = vld [vmem:[#allocation7 + $0x20] sm:$0xff]  }
  0x97   : > { %1163 = vmatpush1.bf16.msra.mxu0 %v2239_v14  ;;  %v2331_v14 = vld [vmem:[#allocation7 + $0x58] sm:$0xff]  }
  0x98   : > { %1206 = vmatpush1.bf16.msra.mxu1 %v2242_v15  ;;  %1164 = vmatprep.subr.bf16.mxu0 %v2247_v16  ;;  %v2332_v15 = vld [vmem:[#allocation7 + $0x18] sm:$0xff]   ;;  %v2333_v16 = vld [vmem:[#allocation7 + $0x50] sm:$0xff]  }
  0x99   : > { %1207 = vmatprep.subr.bf16.mxu1 %v2250_v17  ;;  %v2339_v17 = vld [vmem:[#allocation7 + $0xf8] sm:$0xff]  }
  0x9b   : > { %1165 = vmatpush1.bf16.msra.mxu0 %v2245_v18  ;;  %v2341_v18 = vld [vmem:[#allocation7 + $0xf0] sm:$0xff]  }
  0x9c   : > { %1208 = vmatpush1.bf16.msra.mxu1 %v2248_v19  ;;  %1166 = vmatprep.subr.bf16.mxu0 %v2253_v20  ;;  %v2342_v19 = vld [vmem:[#allocation7 + $0xb0] sm:$0xff]   ;;  %v2335_v20 = vld [vmem:[#allocation7 + $0x48] sm:$0xff]  }
  0x9d   : > { %1209 = vmatprep.subr.bf16.mxu1 %v2256_v21  ;;  %v2343_v21 = vld [vmem:[#allocation7 + $0xe8] sm:$0xff]  }
  0x9f   : > { %1167 = vmatpush1.bf16.msra.mxu0 %v2251_v22  ;;  %v2336_v22 = vld [vmem:[#allocation7 + $0x8] sm:$0xff]  }
  0xa0   : > { %1210 = vmatpush1.bf16.msra.mxu1 %v2254_v23  ;;  %1168 = vmatprep.subr.bf16.mxu0 %v2259_v24  ;;  %v2344_v23 = vld [vmem:[#allocation7 + $0xa8] sm:$0xff]   ;;  %v2337_v24 = vld [vmem:[#allocation7 + $0x40] sm:$0xff]  }
  0xa1   : > { %1211 = vmatprep.subr.bf16.mxu1 %v2262_v25  ;;  %v2345_v25 = vld [vmem:[#allocation7 + $0xe0] sm:$0xff]  }
  0xa3   : > { %1169 = vmatpush1.bf16.msra.mxu0 %v2257_v26  ;;  %v2338_v26 = vld [vmem:[#allocation7] sm:$0xff]  }
  0xa4   : > { %1212 = vmatpush1.bf16.msra.mxu1 %v2260_v27  ;;  %1170 = vmatprep.subr.bf16.mxu0 %v2265_v28  ;;  %v2346_v27 = vld [vmem:[#allocation7 + $0xa0] sm:$0xff]   ;;  %v2347_v28 = vld [vmem:[#allocation7 + $0xd8] sm:$0xff]  }
  0xa5   : > { %1213 = vmatprep.subr.bf16.mxu1 %v2268_v29  ;;  %v2348_v29 = vld [vmem:[#allocation7 + $0x98] sm:$0xff]  }
  0xa7   : > { %1171 = vmatpush1.bf16.msra.mxu0 %v2263_v30  ;;  %v2349_v30 = vld [vmem:[#allocation7 + $0xd0] sm:$0xff]  }
  0xa8   : > { %1214 = vmatpush1.bf16.msra.mxu1 %v2266_v31  ;;  %1172 = vmatprep.subr.bf16.mxu0 %v2271_v32  ;;  %v2350_v31 = vld [vmem:[#allocation7 + $0x90] sm:$0xff]   ;;  %v2351_v32 = vld [vmem:[#allocation7 + $0xc8] sm:$0xff]  }
  0xa9   : > { %1215 = vmatprep.subr.bf16.mxu1 %v2274_v33  ;;  %v2352_v33 = vld [vmem:[#allocation7 + $0x88] sm:$0xff]  }
  0xab   : > { %1173 = vmatpush1.bf16.msra.mxu0 %v2269_v34  ;;  %v2353_v34 = vld [vmem:[#allocation7 + $0xc0] sm:$0xff]  }
  0xac   : > { %1216 = vmatpush1.bf16.msra.mxu1 %v2272_v35  ;;  %1174 = vmatprep.subr.bf16.mxu0 %v2277_v36  ;;  %v2354_v35 = vld [vmem:[#allocation7 + $0x80] sm:$0xff]  }
  0xad   : > { %1217 = vmatprep.subr.bf16.mxu1 %v2280_v37 }
  0xaf   : > { %1175 = vmatpush2.bf16.msra.mxu0 %v2275_v38 }
  0xb0   : > { %1218 = vmatpush2.bf16.msra.mxu1 %v2278_v39  ;;  %1176 = vmatprep.subr.bf16.mxu0 %v2283_v40 }
  0xb1   : > { %1219 = vmatprep.subr.bf16.mxu1 %v2286_v41 }
  0xb3   : > { %1177 = vmatpush2.bf16.msra.mxu0 %v2281_v42 }
  0xb4   : > { %1220 = vmatpush2.bf16.msra.mxu1 %v2284_v43  ;;  %1178 = vmatprep.subr.bf16.mxu0 %v2289_v44 }
  0xb5   : > { %1221 = vmatprep.subr.bf16.mxu1 %v2292_v45 }
  0xb7   : > { %1179 = vmatpush2.bf16.msra.mxu0 %v2287_v46 }
  0xb8   : > { %1222 = vmatpush2.bf16.msra.mxu1 %v2290_v47  ;;  %1180 = vmatprep.subr.bf16.mxu0 %v2295_v48 }
  0xb9   : > { %1223 = vmatprep.subr.bf16.mxu1 %v2298_v49 }
  0xbb   : > { %1181 = vmatpush2.bf16.msra.mxu0 %v2293_v50 }
  0xbc   : > { %1224 = vmatpush2.bf16.msra.mxu1 %v2296_v51  ;;  %1182 = vmatprep.subr.bf16.mxu0 %v2301_v52 }
  0xbd   : > { %1225 = vmatprep.subr.bf16.mxu1 %v2304_v53 }
  0xbf   : > { %1183 = vmatpush2.bf16.msra.mxu0 %v2299_v54 }
  0xc0   : > { %1226 = vmatpush2.bf16.msra.mxu1 %v2302_v55  ;;  %1184 = vmatprep.subr.bf16.mxu0 %v2307_v56 }
  0xc1   : > { %1227 = vmatprep.subr.bf16.mxu1 %v2310_v57 }
  0xc3   : > { %1185 = vmatpush2.bf16.msra.mxu0 %v2305_v58 }
  0xc4   : > { %1228 = vmatpush2.bf16.msra.mxu1 %v2308_v59  ;;  %1186 = vmatprep.subr.bf16.mxu0 %v2313_v60 }
  0xc5   : > { %1229 = vmatprep.subr.bf16.mxu1 %v2316_v61 }
  0xc7   : > { %1187 = vmatpush2.bf16.msra.mxu0 %v2311_v62 }
  0xc8   : > { %1230 = vmatpush2.bf16.msra.mxu1 %v2314_v63  ;;  %1188 = vmatprep.subr.bf16.mxu0 %v2319_v0 }
  0xc9   : > { %1231 = vmatprep.subr.bf16.mxu1 %v2322_v1 }
  0xcb   : > { %1189 = vmatpush2.bf16.msra.mxu0 %v2317_v2 }
  0xcc   : > { %1232 = vmatpush2.bf16.msra.mxu1 %v2320_v3  ;;  %1987 = vmatprep.subr.bf16.mxu0 %v2323_v6 }
  0xcd   : > { %2009 = vmatprep.subr.bf16.mxu1 %v2339_v17 }
  0xce   : > { %1191 = vmatmul.mubr.bf16.vlgmr.msra.gmra.mxu0 %v2736_v4  ;;  %v2340_v4 = vld [vmem:[#allocation7 + $0xb8] sm:$0xff]  }
  0xcf   : > { %1234 = vmatmul.mubr.bf16.vlgmr.msra.gmra.mxu1 %v2739_v5  ;;  %1988 = vmatpush3.bf16.msra.mxu0 %v2324_v7  ;;  %v2334_v5 = vld [vmem:[#allocation7 + $0x10] sm:$0xff]  }
  0xd0   : > { %1989 = vmatprep.subr.bf16.mxu0 %v2325_v8  ;;  %2010 = vmatpush3.bf16.msra.mxu1 %v2340_v4 }
  0xd1   : > { %2011 = vmatprep.subr.bf16.mxu1 %v2341_v18 }
  0xd3   : > { %1990 = vmatpush3.bf16.msra.mxu0 %v2326_v9 }
  0xd4   : > { %1991 = vmatprep.subr.bf16.mxu0 %v2327_v10  ;;  %2012 = vmatpush3.bf16.msra.mxu1 %v2342_v19 }
  0xd5   : > { %2013 = vmatprep.subr.bf16.mxu1 %v2343_v21 }
  0xd7   : > { %1992 = vmatpush3.bf16.msra.mxu0 %v2328_v11 }
  0xd8   : > { %1993 = vmatprep.subr.bf16.mxu0 %v2329_v12  ;;  %2014 = vmatpush3.bf16.msra.mxu1 %v2344_v23 }
  0xd9   : > { %2015 = vmatprep.subr.bf16.mxu1 %v2345_v25 }
  0xdb   : > { %1994 = vmatpush3.bf16.msra.mxu0 %v2330_v13 }
  0xdc   : > { %1995 = vmatprep.subr.bf16.mxu0 %v2331_v14  ;;  %2016 = vmatpush3.bf16.msra.mxu1 %v2346_v27 }
  0xdd   : > { %2017 = vmatprep.subr.bf16.mxu1 %v2347_v28 }
  0xdf   : > { %1996 = vmatpush3.bf16.msra.mxu0 %v2332_v15 }
  0xe0   : > { %1997 = vmatprep.subr.bf16.mxu0 %v2333_v16  ;;  %2018 = vmatpush3.bf16.msra.mxu1 %v2348_v29 }
  0xe1   : > { %2019 = vmatprep.subr.bf16.mxu1 %v2349_v30 }
  0xe3   : > { %1998 = vmatpush3.bf16.msra.mxu0 %v2334_v5 }
  0xe4   : > { %1999 = vmatprep.subr.bf16.mxu0 %v2335_v20  ;;  %2020 = vmatpush3.bf16.msra.mxu1 %v2350_v31 }
  0xe5   : > { %2021 = vmatprep.subr.bf16.mxu1 %v2351_v32 }
  0xe7   : > { %2000 = vmatpush3.bf16.msra.mxu0 %v2336_v22 }
  0xe8   : > { %2001 = vmatprep.subr.bf16.mxu0 %v2337_v24  ;;  %2022 = vmatpush3.bf16.msra.mxu1 %v2352_v33  ;;  %v1600_v24 = vlaneseq }
  0xe9   : > { %2023 = vmatprep.subr.bf16.mxu1 %v2353_v34 }
  0xea   : > { %v1601_v25 = vshrl.u32 %v1600_v24, 7 }
  0xeb   : > { %2002 = vmatpush3.bf16.msra.mxu0 %v2338_v26 }
  0xec   : > { %2024 = vmatpush3.bf16.msra.mxu1 %v2354_v35  ;;  %v1602_v27 = vadd.s32 8, %v1601_v25 }
  0xee   : > { %vm1608_vm0 = vcmp.lt.s32.totalorder %v1602_v27, 11 }
 0x14e   : > { %v1106_v36 = vpop.f32.mrf.mxu0 }
 0x14f   : > { %v1149_v37 = vpop.f32.mrf.mxu1 }
 0x150   : > { %v1108_v38 = vpop.f32.mrf.mxu0  ;;  %v1150_v44 = vadd.f32 %v1149_v37, %v1106_v36 }
 0x151   : > { %v1151_v39 = vpop.f32.mrf.mxu1 }
 0x152   : > { %v1110_v40 = vpop.f32.mrf.mxu0  ;;  %v1152_v42 = vadd.f32 %v1151_v39, %v1108_v38  ;;  %v1244_v51 = vmul.f32 %v1150_v44, %v1150_v44 }
 0x153   : > { %v1153_v41 = vpop.f32.mrf.mxu1 }
 0x154   : > { %v1154_v43 = vadd.f32 %v1153_v41, %v1110_v40  ;;  %v1112_v45 = vpop.f32.mrf.mxu0  ;;  %v1245_v49 = vmul.f32 %v1152_v42, %v1152_v42 }
 0x155   : > { %v1155_v46 = vpop.f32.mrf.mxu1 }
 0x156   : > { %v1156_v47 = vadd.f32 %v1155_v46, %v1112_v45  ;;  %v1248_v48 = vmul.f32 %v1154_v43, %v1154_v43 }
 0x158   : > { %v1249_v50 = vmul.f32 %v1156_v47, %v1156_v47  ;;  %v1252_v53 = vpack.c.bf16 %v1248_v48, %v1244_v51 }
 0x15a   : > { %v1253_v52 = vpack.c.bf16 %v1249_v50, %v1245_v49 }
 0x15c   : > { %1544 = vmatprep.mubr.bf16.mxu0 %v1253_v52 }
 0x15d   : > { %1545 = vmatmul.mubr.bf16.vlgmr.msra.gmra.mxu0 %v1252_v53 }
 0x18e   : > { %v1192_v54 = vpop.f32.mrf.mxu0 }
 0x18f   : > { %v1235_v55 = vpop.f32.mrf.mxu1 }
 0x190   : > { %v1194_v56 = vpop.f32.mrf.mxu0  ;;  %v1236_v62 = vadd.f32 %v1235_v55, %v1192_v54 }
 0x191   : > { %v1237_v57 = vpop.f32.mrf.mxu1 }
 0x192   : > { %v1196_v58 = vpop.f32.mrf.mxu0  ;;  %v1238_v60 = vadd.f32 %v1237_v57, %v1194_v56  ;;  %v1246_v7 = vmul.f32 %v1236_v62, %v1236_v62 }
 0x193   : > { %v1239_v59 = vpop.f32.mrf.mxu1 }
 0x194   : > { %v1240_v61 = vadd.f32 %v1239_v59, %v1196_v58  ;;  %v1198_v63 = vpop.f32.mrf.mxu0  ;;  %v1247_v3 = vmul.f32 %v1238_v60, %v1238_v60 }
 0x195   : > { %v1241_v0 = vpop.f32.mrf.mxu1 }
 0x196   : > { %v1242_v1 = vadd.f32 %v1241_v0, %v1198_v63  ;;  %v1250_v2 = vmul.f32 %v1240_v61, %v1240_v61 }
 0x198   : > { %v1251_v6 = vmul.f32 %v1242_v1, %v1242_v1  ;;  %v1254_v9 = vpack.c.bf16 %v1250_v2, %v1246_v7 }
 0x19a   : > { %v1255_v8 = vpack.c.bf16 %v1251_v6, %v1247_v3 }
 0x19c   : > { %1585 = vmatprep.mubr.bf16.mxu1 %v1255_v8 }
 0x19d   : > { %1586 = vmatmul.mubr.bf16.vlgmr.msra.gmra.mxu1 %v1254_v9 }
 0x21d   : > { %v2003_v10 = vpop.f32.mrf.mxu0 }
 0x21f   : > { %v2004_v11 = vpop.f32.mrf.mxu0 }
 0x220   : > { %v2005_v13 = vadd.f32 %v2004_v11, %v2003_v10 }
 0x221   : > { %v2006_v12 = vpop.f32.mrf.mxu0 }
 0x222   : > { %v1547_v17 = vadd.f32 1e-06, %v2005_v13 }
 0x223   : > { %v2007_v14 = vpop.f32.mrf.mxu0 }
 0x224   : > { %v2008_v4 = vadd.f32 %v2007_v14, %v2006_v12 }
 0x226   : > { %v1550_v21 = vadd.f32 1e-06, %v2008_v4 }
 0x25d   : > { %v2025_v15 = vpop.f32.mrf.mxu1 }
 0x25f   : > { %v2026_v16 = vpop.f32.mrf.mxu1 }
 0x260   : > { %v2027_v18 = vadd.f32 %v2026_v16, %v2025_v15 }
 0x261   : > { %v2028_v5 = vpop.f32.mrf.mxu1 }
 0x262   : > { %v1588_v19 = vadd.f32 %v2027_v18, %v1547_v17 }
 0x263   : > { %v2029_v20 = vpop.f32.mrf.mxu1 }
 0x264   : > { %2355 = vlog2.f32 %v1588_v19  ;;  %v2030_v22 = vadd.f32 %v2029_v20, %v2028_v5 }
 0x266   : > { %v1591_v23 = vadd.f32 %v2030_v22, %v1550_v21 }
 0x268   : > { %2357 = vlog2.f32 %v1591_v23 }
 0x271   : > { %v2356_v26 = vpop.eup %2355 }
 0x272   : > { %v1595_v28 = vmul.f32 0.6931472, %v2356_v26 }
 0x274   : > { %1598 = vst [vmem:[%s269_s25] sm:$0xff] %v1595_v28 }
 0x275   : > { %v2358_v29 = vpop.eup %2357 }
 0x276   : > { %v1597_v30 = vmul.f32 0.6931472, %v2358_v29 }
 0x278   : > { %1599 = vst [vmem:[%s269_s25 + $0x8] sm:$0xff] %v1597_v30  ;;  %v1614_v31 = vsel %vm1608_vm0, %v1597_v30, 0.0 }
 0x279   : > { %v1615_v32 = vadd.f32 %v1614_v31, %v1595_v28 }
 0x27a   : > { %2452 = shalt.err (!%p2449_p2)
}
 0x27b   : > { %s2453_s9 = scalar_lea.hbm %s2750_s24, 256  ;;  %s2457_s23 = scalar_lea.hbm %s2827_s3, 512 }
 0x27c   : > { %p2454_p9 = scmp.ne.s32.totalorder %s2750_s24, %s2453_s9  ;;  %p2458_p0 = scmp.lt.s32.totalorder %s2750_s24, %s2827_s3 }
 0x27d   : > { %p2459_p7 = scmp.lt.s32.totalorder %s2457_s23, %s2453_s9 }
 0x27e   : > { %p2455_p12 = pnand %p2454_p9, %p2689_p3 }
 0x27f   : > { %p2460_p5 = por %p2459_p7, %p2458_p0 }
 0x280   : > { %p2456_p13 = pneg %p2455_p12 }
 0x282   : > { %p2461_p1 = pnand %p2460_p5, %p2456_p13 }
 0x284   : > { %2464 = shalt.err (!%p2461_p1)
}
 0x285   : > { %s2563_s14 = smov 128   ;;  %s2564_s22 = smov 8   ;;  %v1616_v33 = vrot.slane %v1615_v32, 4  ;;  %vm1622_vm1 = vcmp.eq.s32.totalorder %v1601_v25, 0 }
 0x286   : > { %2041 = dma.vmem_to_hbm [thread:$0]  (%p2689_p3), %s2752_s27, 256, %s2750_s24, %s1626_s30, %s2563_s14, %s2563_s14, %s2564_s22  }
 0x287   : > { %v1617_v34 = vadd.f32 %v1616_v33, %v1615_v32  ;;  %s1813_s29 = sshll.u32 %s2719_s7, 3  ;;  %s1982_s10 = sshll.u32 %s2545_s18, 7 }
 0x288   : > { %s276_s6 = scalar_lea.vmem [#allocation9], %s1813_s29  ;;  %s2782_s21 = scalar_lea.hbm %s2828_s4, %s1982_s10 }
 0x289   : > { %v1618_v35 = vrot.slane %v1617_v34, 2  ;;  %s1663_s12 = sshll.u32 %s276_s6, 4  ;;  %s1631_s27 = scalar_lea.sflag [#allocation10], %s2719_s7  ;;  %s1664_s12 = int_to_ptr.vmem [resolvable:$true] %s1663_s12 }
 0x28a   : > { %s2465_s24 = scalar_lea.vmem %s1664_s12, 128  ;;  %s2565_s30 = smov [#allocation9]  }
 0x28b   : > { %v1619_v36 = vadd.f32 %v1618_v35, %v1617_v34  ;;  %p2466_p4 = scmp.ne.s32.totalorder %s1664_s12, %s2465_s24  ;;  %s2469_s18 = sshll.u32 %s2565_s30, 4  ;;  %s2470_s18 = int_to_ptr.vmem [resolvable:$false] %s2469_s18 }
 0x28c   : > { %s2471_s23 = scalar_lea.vmem %s2470_s18, 256  ;;  %p2472_p10 = scmp.lt.s32.totalorder %s1664_s12, %s2470_s18 }
 0x28d   : > { %v1620_v37 = vrot.slane %v1619_v36, 1  ;;  %p2467_p6 = pnand %p2466_p4, %p2689_p3  ;;  %p2473_p11 = scmp.lt.s32.totalorder %s2471_s23, %s2465_s24 }
 0x28f   : > { %v1621_v38 = vadd.f32 %v1620_v37, %v1619_v36  ;;  %p2468_p8 = pneg %p2467_p6  ;;  %p2474_p2 = por %p2473_p11, %p2472_p10 }
 0x291   : > { %v1623_v39 = vsel %vm1622_vm1, %v1621_v38, 0.0  ;;  %p2475_p9 = pnand %p2474_p2, %p2468_p8 }
 0x292   : > { %1624 = vst [vmem:[%s276_s6] sm:$0xff] %v1623_v39 }
 0x293   : > { %2478 = shalt.err (!%p2475_p9)
}
 0x294   : > { %s2479_s25 = scalar_lea.hbm %s2782_s21, 128  ;;  %s2483_s14 = scalar_lea.hbm %s2828_s4, 256 }
 0x295   : > { %p2480_p12 = scmp.ne.s32.totalorder %s2782_s21, %s2479_s25  ;;  %p2484_p7 = scmp.lt.s32.totalorder %s2782_s21, %s2828_s4 }
 0x296   : > { %p2485_p5 = scmp.lt.s32.totalorder %s2483_s14, %s2479_s25 }
 0x297   : > { %p2481_p13 = pnand %p2480_p12, %p2689_p3 }
 0x298   : > { %p2486_p1 = por %p2485_p5, %p2484_p7 }
 0x299   : > { %p2482_p0 = pneg %p2481_p13 }
 0x29b   : > { %p2487_p4 = pnand %p2486_p1, %p2482_p0 }
 0x29d   : > { %2490 = shalt.err (!%p2487_p4)
}
 0x29e   : > { %2042 = dma.vmem_to_hbm [thread:$0]  (%p2689_p3), %s1664_s12, 128, %s2782_s21, %s1631_s27  }
 0x29f PF: > { %s1675_s10 = sand.u32 1, %s2533_s15   ;;  %p2841_p6 = scmp.ne.s32.totalorder %s2834_s26, 0 }
 0x2a0   : > { %p2842_p8 = scmp.ge.s32.totalorder %s2553_s20, 2  ;;  %s1676_s6 = scalar_lea.sflag [#allocation4], %s1675_s10 }
 0x2a2   : > { %p2057_p10 = pnand %p2842_p8, %p2841_p6 }
 0x2a4   : > { %p2058_p11 = pneg %p2057_p10 }
 0x2a6   : > { %2524 = dma.done.wait (%p2058_p11), %s1676_s6, 256  }
 0x2a7   : > { %2526 = vsyncadd (%p2058_p11), %s1676_s6, 4294967040  ;;  %s1685_s9 = scalar_lea.sflag [#allocation10], %s1675_s10 }
 0x2a8   : > { %2528 = dma.done.wait (%p2058_p11), %s1685_s9, 128  }
 0x2a9   : > { %2530 = vsyncadd (%p2058_p11), %s1685_s9, 4294967168  ;;  %s25_s20 = sadd.s32 1, %s2553_s20   ;;  %s2843_s15 = smov %s2537_s16 }
 0x2aa   : > { %p22_p2 = scmp.ge.s32.totalorder %s25_s20, 4   ;;  %s2844_s16 = smov %s2541_s17 }
 0x2ab   : > { %s2845_s17 = smov %s2698_s11  ;;  %s2846_s18 = smov %s2549_s19 }
 0x2ac   : > { %s2847_s19 = smov %s2849_s28  ;;  %24 = sbr.rel (!%p22_p2) target bundleno = 9 (0x9), region = 102 }
 0x2b1   :  { %1690 = vsyncpa [#allocation3], 1 }
 0x2b2   :  { %1692 = vsyncpa [#allocation3 + $0x1], 1 }
 0x2b3   :  { %1693 = vsyncpa [#allocation6], 1 }
 0x2b4   :  { %1694 = vsyncpa [#allocation4], 1 }
 0x2b5   :  { %1696 = vsyncpa [#allocation4 + $0x1], 1 }
 0x2b6   :  { %1697 = vsyncpa [#allocation10], 1 }
 0x2b7   :  { %1699 = vsyncpa [#allocation10 + $0x1], 1 }

</bundles_post_ra>
